<compile_context>
chip_gen: v7x
topology: tpu7x:2x2x1
jax: 0.10.0
libtpu: 0.0.40
codegen_flags: <defaults>
</compile_context>

<pallas_src>
import functools

import jax
import jax.numpy as jnp
from jax.experimental import pallas as pl
from jax.experimental.pallas import tpu as pltpu

HID1_PAD = 512   # 400 -> 512
HID2_PAD = 384   # 300 -> 384 (3 MXU passes on v5e, 2 on v6e/v7x -- keep)
OUT_PAD = 128    # action_dim -> 128 (lane-dense, unmasked vst)


def _round_up(x, m):
    return ((x + m - 1) // m) * m


def _choose_tile(batch, max_tile):
    # Aim for >=2 grid steps whenever the batch allows it (v7x megacore),
    # tile a multiple of 16 (bf16 sublane packing; also satisfies (8,128)).
    half = _round_up(pl.cdiv(batch, 2), 16)
    return max(16, min(max_tile, half))


def actor_kernel(x_ref, w1_ref, b1_ref, w2_ref, b2_ref, w3_ref, b3_ref,
                 out_ref, *, max_action):
    # Layer 1: Linear(state_dim -> 512pad) + ReLU  (bf16 MXU, f32 accumulate)
    x = x_ref[...].astype(jnp.bfloat16)
    h1 = jnp.dot(x, w1_ref[...], preferred_element_type=jnp.float32)
    h1 = jnp.maximum(h1 + b1_ref[...], 0.0)

    # Layer 2: Linear(512pad -> 384pad) + ReLU
    h2 = jnp.dot(h1.astype(jnp.bfloat16), w2_ref[...],
                 preferred_element_type=jnp.float32)
    h2 = jnp.maximum(h2 + b2_ref[...], 0.0)

    # Layer 3: Linear(384pad -> 128pad), tanh (EUP), scale by max_action
    h3 = jnp.dot(h2.astype(jnp.bfloat16), w3_ref[...],
                 preferred_element_type=jnp.float32)
    out_ref[...] = (max_action * jnp.tanh(h3 + b3_ref[...])).astype(out_ref.dtype)


def actor_forward(state, params, max_action, action_dim, *,
                  max_tile=1024, out_dtype=jnp.float32, trim=True):
    """state: (batch, state_dim) f32. params: padded bf16 weights / f32 biases.

    trim=True  -> returns (batch, action_dim) in out_dtype.
    trim=False -> returns the lane-padded (batch, OUT_PAD) block (caller slices
                  lazily / fuses the de-pad into the consumer -- cheaper on HBM).
    """
    w1, b1, w2, b2, w3, b3 = params
    batch, state_dim = state.shape

    tb = _choose_tile(batch, max_tile)
    grid = (pl.cdiv(batch, tb),)          # ragged last tile handled by Pallas
    resident2d = lambda i: (0, 0)         # weights/biases: same block every step

    kernel = functools.partial(actor_kernel, max_action=float(max_action))

    weight_bytes = sum(int(a.size) * a.dtype.itemsize
                       for a in (w1, b1, w2, b2, w3, b3))
    cost = pl.CostEstimate(
        flops=2 * batch * (state_dim * HID1_PAD
                           + HID1_PAD * HID2_PAD
                           + HID2_PAD * OUT_PAD),
        transcendentals=batch * OUT_PAD,
        bytes_accessed=(batch * state_dim * state.dtype.itemsize
                        + weight_bytes
                        + batch * OUT_PAD * jnp.dtype(out_dtype).itemsize),
    )

    out = pl.pallas_call(
        kernel,
        out_shape=jax.ShapeDtypeStruct((batch, OUT_PAD), out_dtype),
        grid=grid,
        in_specs=[
            pl.BlockSpec((tb, state_dim), lambda i: (i, 0)),   # x tile
            pl.BlockSpec(w1.shape, resident2d),
            pl.BlockSpec(b1.shape, resident2d),
            pl.BlockSpec(w2.shape, resident2d),
            pl.BlockSpec(b2.shape, resident2d),
            pl.BlockSpec(w3.shape, resident2d),
            pl.BlockSpec(b3.shape, resident2d),
        ],
        out_specs=pl.BlockSpec((tb, OUT_PAD), lambda i: (i, 0)),
        compiler_params=pltpu.CompilerParams(
            dimension_semantics=("parallel",),   # v7x: shard batch over 2 TCs
            vmem_limit_bytes=32 * 1024 * 1024,   # v5e scoped default is 16 MiB
        ),
        cost_estimate=cost,
    )(state, w1, b1, w2, b2, w3, b3)

    if trim:
        return out[:, :action_dim]
    return out


def init_params(key, state_dim, action_dim):
    """nn.Linear-style init, stored transposed (in, out), zero-padded to
    lane-friendly widths. Weights bf16, biases f32."""
    ks = jax.random.split(key, 6)

    def linear(kw, kb, fan_in, fan_out, pad_in, pad_out):
        bound = 1.0 / jnp.sqrt(fan_in)
        w = jax.random.uniform(kw, (fan_in, fan_out), jnp.float32, -bound, bound)
        b = jax.random.uniform(kb, (1, fan_out), jnp.float32, -bound, bound)
        w = jnp.pad(w, ((0, pad_in - fan_in), (0, pad_out - fan_out)))
        b = jnp.pad(b, ((0, 0), (0, pad_out - fan_out)))
        return w.astype(jnp.bfloat16), b

    # NOTE: for envs with odd state_dim (e.g. 11/17) padding state_dim to a
    # multiple of 16 avoids awkward bf16 packing on layer 1, but layer 1 is
    # tiny; kept unpadded so the wrapper never has to pad x in HBM.
    w1, b1 = linear(ks[0], ks[1], state_dim, 400, state_dim, HID1_PAD)
    w2, b2 = linear(ks[2], ks[3], 400, 300, HID1_PAD, HID2_PAD)
    w3, b3 = linear(ks[4], ks[5], 300, action_dim, HID2_PAD, OUT_PAD)
    return w1, b1, w2, b2, w3, b3


def reference_forward(state, params, max_action, action_dim):
    """Pure-JAX reference mirroring the kernel's bf16/f32 arithmetic."""
    w1, b1, w2, b2, w3, b3 = params
    x = state.astype(jnp.bfloat16)
    h1 = jnp.maximum(
        jnp.dot(x, w1, preferred_element_type=jnp.float32) + b1, 0.0)
    h2 = jnp.maximum(
        jnp.dot(h1.astype(jnp.bfloat16), w2,
                preferred_element_type=jnp.float32) + b2, 0.0)
    h3 = jnp.dot(h2.astype(jnp.bfloat16), w3,
                 preferred_element_type=jnp.float32) + b3
    return (max_action * jnp.tanh(h3))[:, :action_dim]


if __name__ == "__main__":
    key = jax.random.PRNGKey(0)
    k_state, k_params = jax.random.split(key)

    batch, state_dim, action_dim = 2, 16, 8
    max_action = 1.0

    state = jax.random.normal(k_state, (batch, state_dim), dtype=jnp.float32)
    params = init_params(k_params, state_dim, action_dim)

    out = actor_forward(state, params, max_action, action_dim)
    jax.block_until_ready(out)
    assert out.shape == (batch, action_dim)

    ref = reference_forward(state, params, max_action, action_dim)
    assert jnp.allclose(out, ref, atol=1e-4, rtol=1e-4), "mismatch vs reference"

    # Also exercise a ragged, multi-step grid (partial last tile + >=2 steps).
    big_batch = 300
    big_state = jax.random.normal(jax.random.PRNGKey(1),
                                  (big_batch, state_dim), dtype=jnp.float32)
    big_out = actor_forward(big_state, params, max_action, action_dim)
    jax.block_until_ready(big_out)
    big_ref = reference_forward(big_state, params, max_action, action_dim)
    assert jnp.allclose(big_out, big_ref, atol=1e-4, rtol=1e-4), "big mismatch"

    print("KERNEL_OK")
</pallas_src>

<mosaic_0001>
module attributes {stable_mosaic.version = 11 : i64} {
  func.func @actor_kernel(%arg0: i32, %arg1: memref<16x16xf32, #tpu.memory_space<vmem>>, %arg2: memref<16x512xbf16, #tpu.memory_space<vmem>>, %arg3: memref<1x512xf32, #tpu.memory_space<vmem>>, %arg4: memref<512x384xbf16, #tpu.memory_space<vmem>>, %arg5: memref<1x384xf32, #tpu.memory_space<vmem>>, %arg6: memref<384x128xbf16, #tpu.memory_space<vmem>>, %arg7: memref<1x128xf32, #tpu.memory_space<vmem>>, %arg8: memref<16x128xf32, #tpu.memory_space<vmem>>) attributes {dimension_semantics = [#tpu.dimension_semantics<parallel>], iteration_bounds = array<i64: 1>, scalar_prefetch = 0 : i64, scratch_operands = 0 : i64, tpu.core_type = #tpu.core_type<tc>, window_params = [{transform_indices = @transform_0, window_bounds = array<i64: 16, 16>}, {pipeline_mode = #tpu.pipeline_mode<synchronous>, transform_indices = @transform_1, window_bounds = array<i64: 16, 512>}, {pipeline_mode = #tpu.pipeline_mode<synchronous>, transform_indices = @transform_2, window_bounds = array<i64: 1, 512>}, {pipeline_mode = #tpu.pipeline_mode<synchronous>, transform_indices = @transform_3, window_bounds = array<i64: 512, 384>}, {pipeline_mode = #tpu.pipeline_mode<synchronous>, transform_indices = @transform_4, window_bounds = array<i64: 1, 384>}, {pipeline_mode = #tpu.pipeline_mode<synchronous>, transform_indices = @transform_5, window_bounds = array<i64: 384, 128>}, {pipeline_mode = #tpu.pipeline_mode<synchronous>, transform_indices = @transform_6, window_bounds = array<i64: 1, 128>}, {transform_indices = @transform_7, window_bounds = array<i64: 16, 128>}]} {
    %c0 = arith.constant 0 : index
    %c0_0 = arith.constant 0 : index
    %0 = vector.load %arg1[%c0, %c0_0] : memref<16x16xf32, #tpu.memory_space<vmem>>, vector<16x16xf32>
    %1 = arith.truncf %0 : vector<16x16xf32> to vector<16x16xbf16>
    %c0_1 = arith.constant 0 : index
    %c0_2 = arith.constant 0 : index
    %2 = vector.load %arg2[%c0_1, %c0_2] : memref<16x512xbf16, #tpu.memory_space<vmem>>, vector<16x512xbf16>
    %cst = arith.constant dense<0.000000e+00> : vector<16x512xf32>
    %3 = tpu.matmul %1, %2, %cst {dimension_numbers = #tpu.dot_dimension_numbers<[1], [0], [0], [1], [0, 0, 1, 1], [], []>} : vector<16x16xbf16>, vector<16x512xbf16>, vector<16x512xf32> -> vector<16x512xf32>
    %c0_3 = arith.constant 0 : index
    %c0_4 = arith.constant 0 : index
    %4 = vector.load %arg3[%c0_3, %c0_4] : memref<1x512xf32, #tpu.memory_space<vmem>>, vector<1x512xf32>
    %5 = vector.broadcast %4 : vector<1x512xf32> to vector<16x512xf32>
    %6 = arith.addf %3, %5 : vector<16x512xf32>
    %cst_5 = arith.constant 0.000000e+00 : f32
    %7 = vector.broadcast %cst_5 : f32 to vector<16x512xf32>
    %8 = arith.maximumf %6, %7 : vector<16x512xf32>
    %9 = arith.truncf %8 : vector<16x512xf32> to vector<16x512xbf16>
    %c0_6 = arith.constant 0 : index
    %c0_7 = arith.constant 0 : index
    %10 = vector.load %arg4[%c0_6, %c0_7] : memref<512x384xbf16, #tpu.memory_space<vmem>>, vector<512x384xbf16>
    %cst_8 = arith.constant dense<0.000000e+00> : vector<16x384xf32>
    %11 = tpu.matmul %9, %10, %cst_8 {dimension_numbers = #tpu.dot_dimension_numbers<[1], [0], [0], [1], [0, 0, 1, 1], [], []>} : vector<16x512xbf16>, vector<512x384xbf16>, vector<16x384xf32> -> vector<16x384xf32>
    %c0_9 = arith.constant 0 : index
    %c0_10 = arith.constant 0 : index
    %12 = vector.load %arg5[%c0_9, %c0_10] : memref<1x384xf32, #tpu.memory_space<vmem>>, vector<1x384xf32>
    %13 = vector.broadcast %12 : vector<1x384xf32> to vector<16x384xf32>
    %14 = arith.addf %11, %13 : vector<16x384xf32>
    %cst_11 = arith.constant 0.000000e+00 : f32
    %15 = vector.broadcast %cst_11 : f32 to vector<16x384xf32>
    %16 = arith.maximumf %14, %15 : vector<16x384xf32>
    %17 = arith.truncf %16 : vector<16x384xf32> to vector<16x384xbf16>
    %c0_12 = arith.constant 0 : index
    %c0_13 = arith.constant 0 : index
    %18 = vector.load %arg6[%c0_12, %c0_13] : memref<384x128xbf16, #tpu.memory_space<vmem>>, vector<384x128xbf16>
    %cst_14 = arith.constant dense<0.000000e+00> : vector<16x128xf32>
    %19 = tpu.matmul %17, %18, %cst_14 {dimension_numbers = #tpu.dot_dimension_numbers<[1], [0], [0], [1], [0, 0, 1, 1], [], []>} : vector<16x384xbf16>, vector<384x128xbf16>, vector<16x128xf32> -> vector<16x128xf32>
    %c0_15 = arith.constant 0 : index
    %c0_16 = arith.constant 0 : index
    %20 = vector.load %arg7[%c0_15, %c0_16] : memref<1x128xf32, #tpu.memory_space<vmem>>, vector<1x128xf32>
    %21 = vector.broadcast %20 : vector<1x128xf32> to vector<16x128xf32>
    %22 = arith.addf %19, %21 : vector<16x128xf32>
    %23 = math.tanh %22 : vector<16x128xf32>
    %cst_17 = arith.constant 1.000000e+00 : f32
    %24 = vector.broadcast %cst_17 : f32 to vector<16x128xf32>
    %25 = arith.mulf %24, %23 : vector<16x128xf32>
    %c0_18 = arith.constant 0 : index
    %c0_19 = arith.constant 0 : index
    %26 = vector.load %arg8[%c0_18, %c0_19] : memref<16x128xf32, #tpu.memory_space<vmem>>, vector<16x128xf32>
    tpu.vector_store %arg8[%c0_18, %c0_19], %25 {strides = array<i32>} : memref<16x128xf32, #tpu.memory_space<vmem>>, vector<16x128xf32>,
    return
  }
  func.func @transform_0(%arg0: i32) -> (i32, i32) {
    %c0_i32 = arith.constant 0 : i32
    %c0_i32_0 = arith.constant 0 : i32
    return %arg0, %c0_i32 : i32, i32
  }
  func.func @transform_1(%arg0: i32) -> (i32, i32) {
    %c0_i32 = arith.constant 0 : i32
    %c0_i32_0 = arith.constant 0 : i32
    %c0_i32_1 = arith.constant 0 : i32
    return %c0_i32, %c0_i32_0 : i32, i32
  }
  func.func @transform_2(%arg0: i32) -> (i32, i32) {
    %c0_i32 = arith.constant 0 : i32
    %c0_i32_0 = arith.constant 0 : i32
    %c0_i32_1 = arith.constant 0 : i32
    return %c0_i32, %c0_i32_0 : i32, i32
  }
  func.func @transform_3(%arg0: i32) -> (i32, i32) {
    %c0_i32 = arith.constant 0 : i32
    %c0_i32_0 = arith.constant 0 : i32
    %c0_i32_1 = arith.constant 0 : i32
    return %c0_i32, %c0_i32_0 : i32, i32
  }
  func.func @transform_4(%arg0: i32) -> (i32, i32) {
    %c0_i32 = arith.constant 0 : i32
    %c0_i32_0 = arith.constant 0 : i32
    %c0_i32_1 = arith.constant 0 : i32
    return %c0_i32, %c0_i32_0 : i32, i32
  }
  func.func @transform_5(%arg0: i32) -> (i32, i32) {
    %c0_i32 = arith.constant 0 : i32
    %c0_i32_0 = arith.constant 0 : i32
    %c0_i32_1 = arith.constant 0 : i32
    return %c0_i32, %c0_i32_0 : i32, i32
  }
  func.func @transform_6(%arg0: i32) -> (i32, i32) {
    %c0_i32 = arith.constant 0 : i32
    %c0_i32_0 = arith.constant 0 : i32
    %c0_i32_1 = arith.constant 0 : i32
    return %c0_i32, %c0_i32_0 : i32, i32
  }
  func.func @transform_7(%arg0: i32) -> (i32, i32) {
    %c0_i32 = arith.constant 0 : i32
    %c0_i32_0 = arith.constant 0 : i32
    return %arg0, %c0_i32 : i32, i32
  }
}

</mosaic_0001>

<bundles_post_ra>
// kernel: tpu_custom_call.1
= control target key start
LH: loop header
LB: loop body
LE: loop exit
PB: predicated region body
PF: predicated region fallthrough
CT: control target
= control target key end

     0   :  { %12 = vsyncpa [#allocation3], 0  ;;  %s2060_s0 = inlined_call_operand.hbm [shape: f32[2,16], index: 0, kind: input, shape index: {}]   ;;  %s2061_s1 = inlined_call_operand.hbm [shape: bf16[16,512], index: 1, kind: input, shape index: {}]   ;;  %s2062_s2 = inlined_call_operand.vmem [shape: f32[1,512], index: 2, kind: input, shape index: {}]   ;;  %s2063_s3 = inlined_call_operand.hbm [shape: bf16[512,384], index: 3, kind: input, shape index: {}]   ;;  %s2064_s4 = inlined_call_operand.vmem [shape: f32[1,384], index: 4, kind: input, shape index: {}]   ;;  %s2065_s5 = inlined_call_operand.hbm [shape: bf16[384,128], index: 5, kind: input, shape index: {}]   ;;  %s2066_s6 = inlined_call_operand.vmem [shape: f32[1,128], index: 6, kind: input, shape index: {}]   ;;  %s2067_s7 = inlined_call_operand.hbm [shape: f32[2,128], index: 7, kind: output, shape index: {}]  }
   0x1   :  { %13 = vsyncpa [#allocation6], 0 }
   0x2   :  { %14 = vsyncpa [#allocation9], 0 }
   0x3   :  { %15 = vsyncpa [#allocation4], 0 }
   0x4   :  { %20 = vsyncadd [#allocation3], 224  ;;  %s1898_s24 = smov [#allocation5]   ;;  %s1780_s28 = scalar_lea.hbm %s2061_s1, 512 }
   0x5   :  { %s33_s25 = sshll.u32 %s1898_s24, 4  ;;  %p1781_p0 = scmp.ne.s32.totalorder %s2061_s1, %s1780_s28  ;;  %s34_s25 = int_to_ptr.vmem [resolvable:$true] %s33_s25 }
   0x6   :  { %p1784_p1 = scmp.lt.u32.totalorder %s1780_s28, %s2061_s1 }
   0x8   :  { %p1786_p2 = pnand %p1784_p1, %p1781_p0 }
   0xa   :  { %1789 = shalt.err (!%p1786_p2)
}
   0xb   :  { %s1790_s10 = scalar_lea.vmem %s34_s25, 512  ;;  %p1795_p4 = scmp.lt.s32.totalorder %s34_s25, %s34_s25 }
   0xc   :  { %p1791_p3 = scmp.ne.s32.totalorder %s34_s25, %s1790_s10  ;;  %p1796_p5 = scmp.lt.s32.totalorder %s1790_s10, %s1790_s10 }
   0xe   :  { %p1797_p6 = por %p1796_p5, %p1795_p4 }
  0x10   :  { %p1798_p7 = pnand %p1797_p6, %p1791_p3 }
  0x12   :  { %1801 = shalt.err (!%p1798_p7)
}
  0x13   :  { %s1899_s11 = smov 256   ;;  %s1900_s12 = smov 16  }
  0x14   :  { %39 = dma.hbm_to_vmem [thread:$0]  %s2061_s1, 512, %s34_s25, [#allocation6], %s1899_s11, %s1899_s11, %s1900_s12  }
  0x15   :  { %s1901_s15 = smov [#allocation2]   ;;  %s1802_s19 = scalar_lea.hbm %s2060_s0, 32 }
  0x16   :  { %s21_s16 = sshll.u32 %s1901_s15, 4  ;;  %p1803_p8 = scmp.ne.s32.totalorder %s2060_s0, %s1802_s19  ;;  %s22_s16 = int_to_ptr.vmem [resolvable:$true] %s21_s16 }
  0x17   :  { %p1806_p9 = scmp.lt.u32.totalorder %s1802_s19, %s2060_s0 }
  0x19   :  { %p1808_p10 = pnand %p1806_p9, %p1803_p8 }
  0x1b   :  { %1811 = shalt.err (!%p1808_p10)
}
  0x1c   :  { %s1812_s24 = scalar_lea.vmem %s22_s16, 32  ;;  %s1816_s1 = scalar_lea.vmem %s22_s16, 256 }
  0x1d   :  { %p1813_p11 = scmp.ne.s32.totalorder %s22_s16, %s1812_s24  ;;  %p1817_p12 = scmp.lt.s32.totalorder %s22_s16, %s22_s16 }
  0x1e   :  { %p1818_p13 = scmp.lt.s32.totalorder %s1816_s1, %s1812_s24 }
  0x20   :  { %p1819_p0 = por %p1818_p13, %p1817_p12 }
  0x22   :  { %p1820_p1 = pnand %p1819_p0, %p1813_p11 }
  0x24   :  { %1823 = shalt.err (!%p1820_p1)
}
  0x25   :  { %s1902_s25 = smov 32   ;;  %s1903_s26 = smov 2  }
  0x26   :  { %27 = dma.hbm_to_vmem [thread:$0]  %s2060_s0, 32, %s22_s16, [#allocation3], %s1902_s25, %s1902_s25, %s1903_s26  }
  0x27   :  { %s1904_s29 = smov [#allocation7]   ;;  %s1824_s10 = scalar_lea.hbm %s2063_s3, 12288 }
  0x28   :  { %s47_s30 = sshll.u32 %s1904_s29, 4  ;;  %p1825_p2 = scmp.ne.s32.totalorder %s2063_s3, %s1824_s10  ;;  %s48_s30 = int_to_ptr.vmem [resolvable:$true] %s47_s30 }
  0x29   :  { %p1828_p3 = scmp.lt.u32.totalorder %s1824_s10, %s2063_s3 }
  0x2b   :  { %p1830_p4 = pnand %p1828_p3, %p1825_p2 }
  0x2d   :  { %1833 = shalt.err (!%p1830_p4)
}
  0x2e   :  { %s1834_s15 = scalar_lea.vmem %s48_s30, 12288  ;;  %p1839_p6 = scmp.lt.s32.totalorder %s48_s30, %s48_s30 }
  0x2f   :  { %p1835_p5 = scmp.ne.s32.totalorder %s48_s30, %s1834_s15  ;;  %p1840_p7 = scmp.lt.s32.totalorder %s1834_s15, %s1834_s15 }
  0x31   :  { %p1841_p8 = por %p1840_p7, %p1839_p6 }
  0x33   :  { %p1842_p9 = pnand %p1841_p8, %p1835_p5 }
  0x35   :  { %1845 = shalt.err (!%p1842_p9)
}
  0x36   :  { %s1905_s0 = smov 192   ;;  %s1906_s16 = smov 12  }
  0x37   :  { %53 = dma.hbm_to_vmem [thread:$0]  %s2063_s3, 12288, %s48_s30, [#allocation6], %s1905_s0, %s1905_s0, %s1906_s16  }
  0x38   :  { %s1907_s19 = smov [#allocation8]   ;;  %s1846_s23 = scalar_lea.hbm %s2065_s5, 3072 }
  0x39   :  { %s61_s20 = sshll.u32 %s1907_s19, 4  ;;  %p1847_p10 = scmp.ne.s32.totalorder %s2065_s5, %s1846_s23  ;;  %s62_s20 = int_to_ptr.vmem [resolvable:$true] %s61_s20 }
  0x3a   :  { %p1850_p11 = scmp.lt.u32.totalorder %s1846_s23, %s2065_s5 }
  0x3c   :  { %p1852_p12 = pnand %p1850_p11, %p1847_p10 }
  0x3e   :  { %1855 = shalt.err (!%p1852_p12)
}
  0x3f   :  { %s1856_s29 = scalar_lea.vmem %s62_s20, 3072  ;;  %p1861_p0 = scmp.lt.s32.totalorder %s62_s20, %s62_s20 }
  0x40   :  { %p1857_p13 = scmp.ne.s32.totalorder %s62_s20, %s1856_s29  ;;  %p1862_p1 = scmp.lt.s32.totalorder %s1856_s29, %s1856_s29 }
  0x42   :  { %p1863_p2 = por %p1862_p1, %p1861_p0 }
  0x44   :  { %p1864_p3 = pnand %p1863_p2, %p1857_p13 }
  0x46   :  { %1867 = shalt.err (!%p1864_p3)
}
  0x47   :  { %s1908_s3 = smov 64   ;;  %s1909_s30 = smov 4  }
  0x48   :  { %67 = dma.hbm_to_vmem [thread:$0]  %s2065_s5, 3072, %s62_s20, [#allocation9], %s1908_s3, %s1908_s3, %s1909_s30  }
  0x49   :  { %1890 = dma.done.wait [#allocation3], 256  }
  0x4a   :  { %1891 = vsyncadd [#allocation3], 4294967040 }
  0x4b   :  { %1892 = dma.done.wait [#allocation6], 12800  }
  0x4c   :  { %1893 = vsyncadd [#allocation6], 4294954496 }
  0x4d   :  { %1894 = dma.done.wait [#allocation9], 3072  }
  0x4e   :  { %1895 = vsyncadd [#allocation9], 4294964224  ;;  %v1910_v0 = vmov 0   ;;  %v1618_v1 = vld [vmem:[#allocation5 + $0x4] ss:$16 sps:$4 sm:$0xff]   ;;  %v84_v4 = vld [vmem:[#allocation2 + $0x8] sm:$0xff]  ;;  %v92_v58 = vlaneseq }
  0x4f   :  { %168 = vmatprep.mubr.bf16.mxu0 %v1910_v0  ;;  %211 = vmatprep.mubr.bf16.mxu1 %v1910_v0  ;;  %v1620_v2 = vld [vmem:[#allocation5] ss:$16 sps:$4 sm:$0xff]   ;;  %v1621_v6 = vld [vmem:[#allocation5 + $0xc] ss:$16 sps:$4 sm:$0xff]   ;;  %vm132_vm0 = vcmask 130048   ;;  %vm1912_vm1 = vmmov 0  }
  0x50   :  { %v83_v3 = vld [vmem:[#allocation2] sm:$0xff]  ;;  %136 = vmatprep.subr.bf16.mxu0 %v1618_v1  ;;  %v1623_v7 = vld [vmem:[#allocation5 + $0x8] ss:$16 sps:$4 sm:$0xff]   ;;  %179 = vmatprep.subr.bf16.mxu1 %v1621_v6  ;;  %v1624_v8 = vld [vmem:[#allocation7] ss:$12 sps:$4 sm:$0xff]   ;;  %v2005_v59 = vshrl.u32 %v92_v58, 7 }
  0x51   :  { %v85_v5 = vpack.c.bf16 %v84_v4, %v83_v3  ;;  %137 = vmatpush1.bf16.msra.mxu0 %v1620_v2  ;;  %v1626_v9 = vld [vmem:[#allocation7 + $0x4] ss:$12 sps:$4 sm:$0xff]   ;;  %180 = vmatpush1.bf16.msra.mxu1 %v1623_v7  ;;  %v1629_v10 = vld [vmem:[#allocation7 + $0x1c] ss:$12 sps:$4 sm:$0xff]   ;;  %v1632_v12 = vld [vmem:[#allocation7 + $0x34] ss:$12 sps:$4 sm:$0xff]  }
  0x52   :  { %891 = vmatprep.subr.bf16.mxu0 %v1626_v9  ;;  %v1627_v11 = vld [vmem:[#allocation7 + $0x18] ss:$12 sps:$4 sm:$0xff]   ;;  %v1630_v13 = vld [vmem:[#allocation7 + $0x30] ss:$12 sps:$4 sm:$0xff]   ;;  %v1633_v15 = vld [vmem:[#allocation7 + $0x48] ss:$12 sps:$4 sm:$0xff]  }
  0x53   :  { %v1635_v14 = vld [vmem:[#allocation7 + $0x4c] ss:$12 sps:$4 sm:$0xff]   ;;  %v1638_v16 = vld [vmem:[#allocation7 + $0x64] ss:$12 sps:$4 sm:$0xff]   ;;  %v1651_v17 = vld [vmem:[#allocation7 + $0xc8] ss:$12 sps:$4 sm:$0xff]  }
  0x54   :  { %1376 = vmatmul.mubr.msk.bf16.vlgmr.msra.gmra.mrb[0].mxu0 %vm132_vm0, %v85_v5  ;;  %1377 = vmatmul.mubr.msk.bf16.vlgmr.msra.gmra.mrb[0].mxu1 %vm132_vm0, %v85_v5  ;;  %v1652_v18 = vld [vmem:[#allocation7 + $0x8] ss:$12 sps:$4 sm:$0xff]   ;;  %v1636_v19 = vld [vmem:[#allocation7 + $0x60] ss:$12 sps:$4 sm:$0xff]   ;;  %v1639_v23 = vld [vmem:[#allocation7 + $0x78] ss:$12 sps:$4 sm:$0xff]  }
  0x55   :  { %892 = vmatpush1.bf16.msra.mxu0 %v1624_v8  ;;  %v1641_v20 = vld [vmem:[#allocation7 + $0x7c] ss:$12 sps:$4 sm:$0xff]   ;;  %1499 = vmatprep.subr.bf16.mxu1 %v1651_v17  ;;  %v1656_v21 = vld [vmem:[#allocation7 + $0xe0] ss:$12 sps:$4 sm:$0xff]   ;;  %v1661_v24 = vld [vmem:[#allocation7 + $0xf8] ss:$12 sps:$4 sm:$0xff]  }
  0x56   :  { %893 = vmatprep.subr.bf16.mxu0 %v1629_v10  ;;  %1500 = vmatpush3.bf16.msra.mxu1 %v1652_v18  ;;  %v1657_v22 = vld [vmem:[#allocation7 + $0x20] ss:$12 sps:$4 sm:$0xff]   ;;  %v1662_v25 = vld [vmem:[#allocation7 + $0x38] ss:$12 sps:$4 sm:$0xff]   ;;  %v1642_v27 = vld [vmem:[#allocation7 + $0x90] ss:$12 sps:$4 sm:$0xff]  }
  0x57   :  { %1501 = vmatprep.subr.bf16.mxu1 %v1656_v21  ;;  %v1644_v26 = vld [vmem:[#allocation7 + $0x94] ss:$12 sps:$4 sm:$0xff]   ;;  %v1666_v28 = vld [vmem:[#allocation7 + $0x110] ss:$12 sps:$4 sm:$0xff]   ;;  %v1647_v30 = vld [vmem:[#allocation7 + $0xac] ss:$12 sps:$4 sm:$0xff]  }
  0x58   :  { %v1667_v29 = vld [vmem:[#allocation7 + $0x50] ss:$12 sps:$4 sm:$0xff]   ;;  %v1671_v31 = vld [vmem:[#allocation7 + $0x128] ss:$12 sps:$4 sm:$0xff]   ;;  %v1676_v35 = vld [vmem:[#allocation7 + $0x140] ss:$12 sps:$4 sm:$0xff]  }
  0x59   :  { %894 = vmatpush1.bf16.msra.mxu0 %v1627_v11  ;;  %v1645_v32 = vld [vmem:[#allocation7 + $0xa8] ss:$12 sps:$4 sm:$0xff]   ;;  %v1650_v33 = vld [vmem:[#allocation7 + $0xc4] ss:$12 sps:$4 sm:$0xff]   ;;  %v1648_v36 = vld [vmem:[#allocation7 + $0xc0] ss:$12 sps:$4 sm:$0xff]  }
  0x5a   :  { %895 = vmatprep.subr.bf16.mxu0 %v1632_v12  ;;  %1502 = vmatpush3.bf16.msra.mxu1 %v1657_v22  ;;  %v1672_v34 = vld [vmem:[#allocation7 + $0x68] ss:$12 sps:$4 sm:$0xff]   ;;  %v1677_v38 = vld [vmem:[#allocation7 + $0x80] ss:$12 sps:$4 sm:$0xff]   ;;  %v1653_v39 = vld [vmem:[#allocation7 + $0xd8] ss:$12 sps:$4 sm:$0xff]  }
  0x5b   :  { %1503 = vmatprep.subr.bf16.mxu1 %v1661_v24  ;;  %v1655_v37 = vld [vmem:[#allocation7 + $0xdc] ss:$12 sps:$4 sm:$0xff]   ;;  %v1660_v40 = vld [vmem:[#allocation7 + $0xf4] ss:$12 sps:$4 sm:$0xff]   ;;  %v1665_v42 = vld [vmem:[#allocation7 + $0x10c] ss:$12 sps:$4 sm:$0xff]  }
  0x5c   :  { %v1658_v41 = vld [vmem:[#allocation7 + $0xf0] ss:$12 sps:$4 sm:$0xff]   ;;  %v1663_v43 = vld [vmem:[#allocation7 + $0x108] ss:$12 sps:$4 sm:$0xff]   ;;  %v1668_v45 = vld [vmem:[#allocation7 + $0x120] ss:$12 sps:$4 sm:$0xff]  }
  0x5d   :  { %896 = vmatpush1.bf16.msra.mxu0 %v1630_v13  ;;  %v1670_v44 = vld [vmem:[#allocation7 + $0x124] ss:$12 sps:$4 sm:$0xff]   ;;  %v1675_v46 = vld [vmem:[#allocation7 + $0x13c] ss:$12 sps:$4 sm:$0xff]   ;;  %v1680_v48 = vld [vmem:[#allocation7 + $0x154] ss:$12 sps:$4 sm:$0xff]  }
  0x5e   :  { %897 = vmatprep.subr.bf16.mxu0 %v1635_v14  ;;  %1504 = vmatpush3.bf16.msra.mxu1 %v1662_v25  ;;  %v1673_v47 = vld [vmem:[#allocation7 + $0x138] ss:$12 sps:$4 sm:$0xff]   ;;  %v1678_v50 = vld [vmem:[#allocation7 + $0x150] ss:$12 sps:$4 sm:$0xff]   ;;  %v1683_v54 = vld [vmem:[#allocation7 + $0x168] ss:$12 sps:$4 sm:$0xff]  }
  0x5f   :  { %1505 = vmatprep.subr.bf16.mxu1 %v1666_v28  ;;  %v1681_v49 = vld [vmem:[#allocation7 + $0x158] ss:$12 sps:$4 sm:$0xff]   ;;  %v1686_v53 = vld [vmem:[#allocation7 + $0x170] ss:$12 sps:$4 sm:$0xff]   ;;  %v1691_v57 = vld [vmem:[#allocation7 + $0x248] ss:$12 sps:$4 sm:$0xff]  }
  0x60   :  { %v1682_v51 = vld [vmem:[#allocation7 + $0x98] ss:$12 sps:$4 sm:$0xff]   ;;  %v1687_v55 = vld [vmem:[#allocation7 + $0xb0] ss:$12 sps:$4 sm:$0xff]   ;;  %v94_v60 = vsub.s32 0, %v2005_v59  ;;  %v98_v62 = vsub.s32 1, %v2005_v59 }
  0x61   :  { %898 = vmatpush1.bf16.msra.mxu0 %v1633_v15  ;;  %v1685_v52 = vld [vmem:[#allocation7 + $0x16c] ss:$12 sps:$4 sm:$0xff]   ;;  %v1690_v56 = vld [vmem:[#allocation7 + $0x184] ss:$12 sps:$4 sm:$0xff]   ;;  %v90_v61 = vld [vmem:[%s2062_s2] sm:$0xf] }
  0x62   :  { %899 = vmatprep.subr.bf16.mxu0 %v1638_v16  ;;  %1506 = vmatpush3.bf16.msra.mxu1 %v1667_v29  ;;  %v102_v63 = vsub.s32 2, %v2005_v59  ;;  %v106_v0 = vsub.s32 3, %v2005_v59  ;;  %v95_v1 = vrot.slane %v90_v61, %v94_v60  ;;  %v99_v2 = vrot.slane %v90_v61, %v98_v62  ;;  %v1722_v58 = vld [vmem:[#allocation7 + $0x218] ss:$12 sps:$4 sm:$0xff]   ;;  %v1769_v59 = vld [vmem:[#allocation8 + $0x88] sm:$0xff]  }
  0x63   :  { %1507 = vmatprep.subr.bf16.mxu1 %v1671_v31  ;;  %v1692_v31 = vld [vmem:[#allocation7 + $0x188] ss:$12 sps:$4 sm:$0xff]  }
  0x64   :  { %v103_v3 = vrot.slane %v90_v61, %v102_v63  ;;  %v107_v5 = vrot.slane %v90_v61, %v106_v0  ;;  %v1725_v61 = vld [vmem:[#allocation7 + $0x22c] ss:$12 sps:$4 sm:$0xff]   ;;  %v1726_v0 = vld [vmem:[#allocation7 + $0x2f0] ss:$12 sps:$4 sm:$0xff]  }
  0x65   :  { %900 = vmatpush1.bf16.msra.mxu0 %v1636_v19 }
  0x66   :  { %901 = vmatprep.subr.bf16.mxu0 %v1641_v20  ;;  %1508 = vmatpush3.bf16.msra.mxu1 %v1672_v34  ;;  %v1696_v34 = vld [vmem:[#allocation7 + $0x260] ss:$12 sps:$4 sm:$0xff]  }
  0x67   :  { %1509 = vmatprep.subr.bf16.mxu1 %v1676_v35 }
  0x69   :  { %902 = vmatpush1.bf16.msra.mxu0 %v1639_v23 }
  0x6a   :  { %903 = vmatprep.subr.bf16.mxu0 %v1644_v26  ;;  %1510 = vmatpush3.bf16.msra.mxu1 %v1677_v38  ;;  %v1697_v38 = vld [vmem:[#allocation7 + $0x1a0] ss:$12 sps:$4 sm:$0xff]  }
  0x6b   :  { %1511 = vmatprep.subr.bf16.mxu1 %v1681_v49  ;;  %v1708_v49 = vld [vmem:[#allocation7 + $0x1e0] ss:$12 sps:$4 sm:$0xff]  }
  0x6d   :  { %904 = vmatpush1.bf16.msra.mxu0 %v1642_v27 }
  0x6e   :  { %905 = vmatprep.subr.bf16.mxu0 %v1647_v30  ;;  %1512 = vmatpush3.bf16.msra.mxu1 %v1682_v51  ;;  %v1688_v30 = vld [vmem:[#allocation7 + $0x180] ss:$12 sps:$4 sm:$0xff]   ;;  %v1715_v51 = vld [vmem:[#allocation7 + $0x1fc] ss:$12 sps:$4 sm:$0xff]  }
  0x6f   :  { %1513 = vmatprep.subr.bf16.mxu1 %v1686_v53  ;;  %v1713_v53 = vld [vmem:[#allocation7 + $0x1f8] ss:$12 sps:$4 sm:$0xff]  }
  0x71   :  { %906 = vmatpush1.bf16.msra.mxu0 %v1645_v32 }
  0x72   :  { %907 = vmatprep.subr.bf16.mxu0 %v1650_v33  ;;  %1514 = vmatpush3.bf16.msra.mxu1 %v1687_v55  ;;  %v1695_v33 = vld [vmem:[#allocation7 + $0x19c] ss:$12 sps:$4 sm:$0xff]   ;;  %v1720_v55 = vld [vmem:[#allocation7 + $0x214] ss:$12 sps:$4 sm:$0xff]  }
  0x73   :  { %1521 = vmatprep.subr.bf16.mxu1 %v1691_v57  ;;  %v1718_v57 = vld [vmem:[#allocation7 + $0x210] ss:$12 sps:$4 sm:$0xff]  }
  0x75   :  { %908 = vmatpush1.bf16.msra.mxu0 %v1648_v36 }
  0x76   :  { %909 = vmatprep.subr.bf16.mxu0 %v1655_v37  ;;  %v1693_v37 = vld [vmem:[#allocation7 + $0x198] ss:$12 sps:$4 sm:$0xff]  }
  0x79   :  { %910 = vmatpush1.bf16.msra.mxu0 %v1653_v39  ;;  %v1700_v39 = vld [vmem:[#allocation7 + $0x1b4] ss:$12 sps:$4 sm:$0xff]  }
  0x7a   :  { %911 = vmatprep.subr.bf16.mxu0 %v1660_v40  ;;  %v1701_v40 = vld [vmem:[#allocation7 + $0x278] ss:$12 sps:$4 sm:$0xff]  }
  0x7d   :  { %912 = vmatpush1.bf16.msra.mxu0 %v1658_v41  ;;  %v1698_v41 = vld [vmem:[#allocation7 + $0x1b0] ss:$12 sps:$4 sm:$0xff]  }
  0x7e   :  { %913 = vmatprep.subr.bf16.mxu0 %v1665_v42  ;;  %v1702_v42 = vld [vmem:[#allocation7 + $0x1b8] ss:$12 sps:$4 sm:$0xff]  }
  0x81   :  { %914 = vmatpush1.bf16.msra.mxu0 %v1663_v43  ;;  %v1705_v43 = vld [vmem:[#allocation7 + $0x1cc] ss:$12 sps:$4 sm:$0xff]  }
  0x82   :  { %915 = vmatprep.subr.bf16.mxu0 %v1670_v44  ;;  %v1706_v44 = vld [vmem:[#allocation7 + $0x290] ss:$12 sps:$4 sm:$0xff]  }
  0x85   :  { %916 = vmatpush1.bf16.msra.mxu0 %v1668_v45  ;;  %v1703_v45 = vld [vmem:[#allocation7 + $0x1c8] ss:$12 sps:$4 sm:$0xff]  }
  0x86   :  { %917 = vmatprep.subr.bf16.mxu0 %v1675_v46  ;;  %v1707_v46 = vld [vmem:[#allocation7 + $0x1d0] ss:$12 sps:$4 sm:$0xff]  }
  0x89   :  { %918 = vmatpush1.bf16.msra.mxu0 %v1673_v47  ;;  %v1710_v47 = vld [vmem:[#allocation7 + $0x1e4] ss:$12 sps:$4 sm:$0xff]  }
  0x8a   :  { %919 = vmatprep.subr.bf16.mxu0 %v1680_v48  ;;  %v1711_v48 = vld [vmem:[#allocation7 + $0x2a8] ss:$12 sps:$4 sm:$0xff]  }
  0x8d   :  { %920 = vmatpush1.bf16.msra.mxu0 %v1678_v50  ;;  %v1712_v50 = vld [vmem:[#allocation7 + $0x1e8] ss:$12 sps:$4 sm:$0xff]  }
  0x8e   :  { %921 = vmatprep.subr.bf16.mxu0 %v1685_v52  ;;  %v1716_v52 = vld [vmem:[#allocation7 + $0x2c0] ss:$12 sps:$4 sm:$0xff]  }
  0x91   :  { %922 = vmatpush1.bf16.msra.mxu0 %v1683_v54  ;;  %v1717_v54 = vld [vmem:[#allocation7 + $0x200] ss:$12 sps:$4 sm:$0xff]  }
  0x92   :  { %934 = vmatprep.subr.bf16.mxu0 %v1690_v56  ;;  %v1721_v56 = vld [vmem:[#allocation7 + $0x2d8] ss:$12 sps:$4 sm:$0xff]  }
 0x127   :  { %v170_v4 = vpop.f32.mrb[0].mxu0  ;;  %v213_v10 = vpop.f32.mrb[0].mxu1 }
 0x128   :  { %v171_v6 = vadd.f32 %v170_v4, %v95_v1  ;;  %v172_v7 = vpop.f32.mrb[1].mxu0  ;;  %v214_v13 = vadd.f32 %v213_v10, %v103_v3  ;;  %v215_v14 = vpop.f32.mrb[1].mxu1  ;;  %v1728_v4 = vld [vmem:[#allocation7 + $0x240] ss:$12 sps:$4 sm:$0xff]   ;;  %v1737_v10 = vld [vmem:[#allocation7 + $0x288] ss:$12 sps:$4 sm:$0xff]  }
 0x129   :  { %v173_v8 = vadd.f32 %v172_v7, %v99_v2  ;;  %v174_v9 = vpop.f32.mrb[2].mxu0  ;;  %v216_v16 = vadd.f32 %v215_v14, %v107_v5  ;;  %v217_v17 = vpop.f32.mrb[2].mxu1  ;;  %v1736_v7 = vld [vmem:[#allocation7 + $0x274] ss:$12 sps:$4 sm:$0xff]   ;;  %v1743_v14 = vld [vmem:[#allocation7 + $0x2b8] ss:$12 sps:$4 sm:$0xff]  }
 0x12a   :  { %v175_v11 = vadd.f32 %v174_v9, %v95_v1  ;;  %v176_v12 = vpop.f32.mrb[3].mxu0  ;;  %v222_v18 = vmax.f32 %v171_v6, 0.0  ;;  %v224_v20 = vmax.f32 %v214_v13, 0.0  ;;  %v218_v21 = vadd.f32 %v217_v17, %v103_v3  ;;  %v219_v22 = vpop.f32.mrb[3].mxu1  ;;  %v1723_v1 = vld [vmem:[#allocation7 + $0x228] ss:$12 sps:$4 sm:$0xff]  }
 0x12b   :  { %v177_v15 = vadd.f32 %v176_v12, %v99_v2  ;;  %v223_v23 = vmax.f32 %v173_v8, 0.0  ;;  %v225_v25 = vmax.f32 %v216_v16, 0.0  ;;  %v220_v26 = vadd.f32 %v219_v22, %v107_v5  ;;  %v1727_v2 = vld [vmem:[#allocation7 + $0x230] ss:$12 sps:$4 sm:$0xff]   ;;  %v1731_v6 = vld [vmem:[#allocation7 + $0x258] ss:$12 sps:$4 sm:$0xff]  }
 0x12c   :  { %v226_v19 = vmax.f32 %v175_v11, 0.0  ;;  %v228_v28 = vmax.f32 %v218_v21, 0.0  ;;  %v1730_v3 = vld [vmem:[#allocation7 + $0x244] ss:$12 sps:$4 sm:$0xff]   ;;  %v1733_v5 = vld [vmem:[#allocation7 + $0x25c] ss:$12 sps:$4 sm:$0xff]  }
 0x12d   :  { %v227_v24 = vmax.f32 %v177_v15, 0.0  ;;  %v229_v32 = vmax.f32 %v220_v26, 0.0  ;;  %v1734_v8 = vld [vmem:[#allocation7 + $0x270] ss:$12 sps:$4 sm:$0xff]   ;;  %v1739_v9 = vld [vmem:[#allocation7 + $0x28c] ss:$12 sps:$4 sm:$0xff]  }
 0x12e   :  { %v230_v27 = vpack.c.bf16 %v226_v19, %v222_v18  ;;  %v2020_v35 = vpack.c.bf16 %v228_v28, %v224_v20  ;;  %v1742_v11 = vld [vmem:[#allocation7 + $0x2a4] ss:$12 sps:$4 sm:$0xff]   ;;  %v1740_v12 = vld [vmem:[#allocation7 + $0x2a0] ss:$12 sps:$4 sm:$0xff]   ;;  %v1745_v13 = vld [vmem:[#allocation7 + $0x2bc] ss:$12 sps:$4 sm:$0xff]  }
 0x12f   :  { %v231_v29 = vpack.c.bf16 %v227_v24, %v223_v23  ;;  %v233_v36 = vpack.c.bf16 %v229_v32, %v225_v25  ;;  %v1748_v15 = vld [vmem:[#allocation7 + $0x2d4] ss:$12 sps:$4 sm:$0xff]   ;;  %v1746_v16 = vld [vmem:[#allocation7 + $0x2d0] ss:$12 sps:$4 sm:$0xff]   ;;  %v1751_v17 = vld [vmem:[#allocation7 + $0x2ec] ss:$12 sps:$4 sm:$0xff]  }
 0x130   :  { %v1749_v18 = vld [vmem:[#allocation7 + $0x2e8] ss:$12 sps:$4 sm:$0xff]   ;;  %v1752_v19 = vld [vmem:[#allocation8 + $0x40] sm:$0xff]   ;;  %v1758_v25 = vld [vmem:[#allocation8 + $0x58] sm:$0xff]  }
 0x131   :  { %923 = vmatprep.mubr.bf16.mxu0 %v231_v29  ;;  %1009 = vmatprep.mubr.bf16.mxu1 %v231_v29  ;;  %v1753_v20 = vld [vmem:[#allocation8] sm:$0xff]   ;;  %v1754_v21 = vld [vmem:[#allocation8 + $0x48] sm:$0xff]   ;;  %v1756_v23 = vld [vmem:[#allocation8 + $0x50] sm:$0xff]  }
 0x132   :  { %924 = vmatmul.mubr.bf16.vlgmr.msra.gmra.mrb[4].mxu0 %v230_v27  ;;  %1010 = vmatmul.mubr.bf16.vlgmr.msra.gmra.mrb[4].mxu1 %v230_v27  ;;  %v1755_v22 = vld [vmem:[#allocation8 + $0x8] sm:$0xff]   ;;  %v1757_v24 = vld [vmem:[#allocation8 + $0x10] sm:$0xff]   ;;  %v1759_v26 = vld [vmem:[#allocation8 + $0x18] sm:$0xff]  }
 0x133   :  { %935 = vmatpush1.bf16.msra.mxu0 %v1688_v30  ;;  %1522 = vmatpush3.bf16.msra.mxu1 %v1692_v31  ;;  %v1760_v27 = vld [vmem:[#allocation8 + $0x60] sm:$0xff]   ;;  %v1762_v29 = vld [vmem:[#allocation8 + $0x68] sm:$0xff]   ;;  %v1764_v31 = vld [vmem:[#allocation8 + $0x70] sm:$0xff]  }
 0x134   :  { %936 = vmatprep.subr.bf16.mxu0 %v1695_v33  ;;  %1523 = vmatprep.subr.bf16.mxu1 %v1696_v34  ;;  %v1761_v28 = vld [vmem:[#allocation8 + $0x20] sm:$0xff]   ;;  %v1763_v30 = vld [vmem:[#allocation8 + $0x28] sm:$0xff]   ;;  %v1765_v32 = vld [vmem:[#allocation8 + $0x30] sm:$0xff]  }
 0x135   :  { %1050 = vmatprep.mubr.bf16.mxu1 %v233_v36  ;;  %966 = vmatprep.mubr.bf16.mxu0 %v233_v36  ;;  %v1766_v33 = vld [vmem:[#allocation8 + $0x78] sm:$0xff]  }
 0x136   :  { %v1767_v34 = vld [vmem:[#allocation8 + $0x38] sm:$0xff]  }
 0x137   :  { %937 = vmatpush1.bf16.msra.mxu0 %v1693_v37  ;;  %1524 = vmatpush3.bf16.msra.mxu1 %v1697_v38 }
 0x138   :  { %938 = vmatprep.subr.bf16.mxu0 %v1700_v39  ;;  %1525 = vmatprep.subr.bf16.mxu1 %v1701_v40 }
 0x13b   :  { %939 = vmatpush1.bf16.msra.mxu0 %v1698_v41  ;;  %1526 = vmatpush3.bf16.msra.mxu1 %v1702_v42  ;;  %v362_v42 = vld [vmem:[%s2064_s4] sm:$0x7] }
 0x13c   :  { %940 = vmatprep.subr.bf16.mxu0 %v1705_v43  ;;  %1527 = vmatprep.subr.bf16.mxu1 %v1706_v44  ;;  %v375_v43 = vrot.slane %v362_v42, %v102_v63 }
 0x13f   :  { %941 = vmatpush1.bf16.msra.mxu0 %v1703_v45  ;;  %1528 = vmatpush3.bf16.msra.mxu1 %v1707_v46 }
 0x140   :  { %942 = vmatprep.subr.bf16.mxu0 %v1710_v47  ;;  %1529 = vmatprep.subr.bf16.mxu1 %v1711_v48 }
 0x143   :  { %943 = vmatpush1.bf16.msra.mxu0 %v1708_v49  ;;  %1530 = vmatpush3.bf16.msra.mxu1 %v1712_v50 }
 0x144   :  { %944 = vmatprep.subr.bf16.mxu0 %v1715_v51  ;;  %1531 = vmatprep.subr.bf16.mxu1 %v1716_v52 }
 0x147   :  { %945 = vmatpush1.bf16.msra.mxu0 %v1713_v53  ;;  %1532 = vmatpush3.bf16.msra.mxu1 %v1717_v54 }
 0x148   :  { %946 = vmatprep.subr.bf16.mxu0 %v1720_v55  ;;  %1533 = vmatprep.subr.bf16.mxu1 %v1721_v56 }
 0x14b   :  { %947 = vmatpush1.bf16.msra.mxu0 %v1718_v57  ;;  %1534 = vmatpush3.bf16.msra.mxu1 %v1722_v58  ;;  %v367_v57 = vrot.slane %v362_v42, %v94_v60  ;;  %v371_v58 = vrot.slane %v362_v42, %v98_v62  ;;  %v1770_v60 = vld [vmem:[#allocation8 + $0x90] sm:$0xff]   ;;  %v1771_v62 = vld [vmem:[#allocation8 + $0x98] sm:$0xff]  }
 0x14c   :  { %948 = vmatprep.subr.bf16.mxu0 %v1725_v61  ;;  %1535 = vmatprep.subr.bf16.mxu1 %v1726_v0 }
 0x14f   :  { %949 = vmatpush1.bf16.msra.mxu0 %v1723_v1  ;;  %1536 = vmatpush3.bf16.msra.mxu1 %v1727_v2 }
 0x150   :  { %950 = vmatprep.subr.bf16.mxu0 %v1730_v3  ;;  %1543 = vmatprep.subr.bf16.mxu1 %v1752_v19 }
 0x152   :  { %1051 = vmatmul.mubr.bf16.vlgmr.msra.gmra.mrb[8].mxu1 %v2020_v35 }
 0x153   :  { %951 = vmatpush1.bf16.msra.mxu0 %v1728_v4  ;;  %1544 = vmatpush3.bf16.msra.mxu1 %v1753_v20 }
 0x154   :  { %952 = vmatprep.subr.bf16.mxu0 %v1733_v5  ;;  %1545 = vmatprep.subr.bf16.mxu1 %v1754_v21 }
 0x157   :  { %953 = vmatpush1.bf16.msra.mxu0 %v1731_v6  ;;  %1546 = vmatpush3.bf16.msra.mxu1 %v1755_v22 }
 0x158   :  { %954 = vmatprep.subr.bf16.mxu0 %v1736_v7  ;;  %1547 = vmatprep.subr.bf16.mxu1 %v1756_v23  ;;  %v1474_v23 = vld [vmem:[%s2066_s6] ss:$0 sm:$0xff] }
 0x15b   :  { %955 = vmatpush1.bf16.msra.mxu0 %v1734_v8  ;;  %1548 = vmatpush3.bf16.msra.mxu1 %v1757_v24 }
 0x15c   :  { %956 = vmatprep.subr.bf16.mxu0 %v1739_v9  ;;  %1549 = vmatprep.subr.bf16.mxu1 %v1758_v25 }
 0x15f   :  { %957 = vmatpush1.bf16.msra.mxu0 %v1737_v10  ;;  %1550 = vmatpush3.bf16.msra.mxu1 %v1759_v26 }
 0x160   :  { %958 = vmatprep.subr.bf16.mxu0 %v1742_v11  ;;  %1551 = vmatprep.subr.bf16.mxu1 %v1760_v27 }
 0x163   :  { %959 = vmatpush1.bf16.msra.mxu0 %v1740_v12  ;;  %1552 = vmatpush3.bf16.msra.mxu1 %v1761_v28  ;;  %v1768_v12 = vld [vmem:[#allocation8 + $0x80] sm:$0xff]  }
 0x164   :  { %960 = vmatprep.subr.bf16.mxu0 %v1745_v13  ;;  %1553 = vmatprep.subr.bf16.mxu1 %v1762_v29  ;;  %v1772_v13 = vld [vmem:[#allocation8 + $0xa0] sm:$0xff]  }
 0x167   :  { %961 = vmatpush1.bf16.msra.mxu0 %v1743_v14  ;;  %1554 = vmatpush3.bf16.msra.mxu1 %v1763_v30  ;;  %v1773_v14 = vld [vmem:[#allocation8 + $0xa8] sm:$0xff]  }
 0x168   :  { %962 = vmatprep.subr.bf16.mxu0 %v1748_v15  ;;  %1555 = vmatprep.subr.bf16.mxu1 %v1764_v31  ;;  %v1774_v15 = vld [vmem:[#allocation8 + $0xb0] sm:$0xff]  }
 0x16b   :  { %963 = vmatpush1.bf16.msra.mxu0 %v1746_v16  ;;  %1556 = vmatpush3.bf16.msra.mxu1 %v1765_v32  ;;  %v1775_v16 = vld [vmem:[#allocation8 + $0xb8] sm:$0xff]  }
 0x16c   :  { %964 = vmatprep.subr.bf16.mxu0 %v1751_v17  ;;  %1557 = vmatprep.subr.bf16.mxu1 %v1766_v33 }
 0x16f   :  { %965 = vmatpush1.bf16.msra.mxu0 %v1749_v18  ;;  %1558 = vmatpush3.bf16.msra.mxu1 %v1767_v34 }
 0x172   :  { %967 = vmatmul.mubr.bf16.vlgmr.msra.gmra.mrb[4].mxu0 %v2020_v35  ;;  %v1911_v35 = vmov 0.0  }
 0x173   :  { %1574 = vmatprep.subr.bf16.mxu1 %v1911_v35 }
 0x205   :  { %v1515_v36 = vpop.f32.mrb[4].mxu1 }
 0x206   :  { %v1516_v37 = vpop.f32.mrb[5].mxu1 }
 0x207   :  { %v1517_v38 = vadd.f32 %v1516_v37, %v1515_v36  ;;  %v1518_v39 = vpop.f32.mrb[6].mxu1 }
 0x208   :  { %v1519_v40 = vpop.f32.mrb[7].mxu1 }
 0x209   :  { %v1520_v41 = vadd.f32 %v1519_v40, %v1518_v39  ;;  %v1012_v46 = vadd.f32 %v1517_v38, %v375_v43 }
 0x20b   :  { %v1015_v50 = vadd.f32 %v1520_v41, %v375_v43 }
 0x225   :  { %v1537_v44 = vpop.f32.mrb[8].mxu1 }
 0x226   :  { %v1538_v45 = vpop.f32.mrb[9].mxu1 }
 0x227   :  { %v1539_v47 = vadd.f32 %v1538_v45, %v1537_v44  ;;  %v1540_v48 = vpop.f32.mrb[10].mxu1 }
 0x228   :  { %v1541_v49 = vpop.f32.mrb[11].mxu1 }
 0x229   :  { %v1053_v51 = vadd.f32 %v1539_v47, %v1012_v46  ;;  %v1542_v52 = vadd.f32 %v1541_v49, %v1540_v48 }
 0x22b   :  { %v1056_v53 = vadd.f32 %v1542_v52, %v1015_v50  ;;  %v1061_v54 = vmax.f32 %v1053_v51, 0.0 }
 0x22d   :  { %v1064_v55 = vmax.f32 %v1056_v53, 0.0 }
 0x22f   :  { %v1067_v56 = vpack.c.bf16 %v1064_v55, %v1061_v54 }
 0x245   :  { %v968_v63 = vpop.f32.mrb[4].mxu0 }
 0x246   :  { %v1594_v61 = vadd.f32 %v968_v63, %v367_v57  ;;  %v970_v0 = vpop.f32.mrb[5].mxu0 }
 0x247   :  { %v1595_v1 = vadd.f32 %v970_v0, %v371_v58  ;;  %v972_v2 = vpop.f32.mrb[6].mxu0 }
 0x248   :  { %v1596_v3 = vadd.f32 %v972_v2, %v367_v57  ;;  %v974_v4 = vpop.f32.mrb[7].mxu0  ;;  %v1059_v6 = vmax.f32 %v1594_v61, 0.0 }
 0x249   :  { %v1597_v5 = vadd.f32 %v974_v4, %v371_v58  ;;  %v1060_v8 = vmax.f32 %v1595_v1, 0.0 }
 0x24a   :  { %v1062_v7 = vmax.f32 %v1596_v3, 0.0 }
 0x24b   :  { %v1063_v9 = vmax.f32 %v1597_v5, 0.0 }
 0x24c   :  { %v1065_v10 = vpack.c.bf16 %v1062_v7, %v1059_v6 }
 0x24d   :  { %v1066_v11 = vpack.c.bf16 %v1063_v9, %v1060_v8 }
 0x24f   :  { %1299 = vmatprep.mubr.bf16.mxu1 %v1066_v11 }
 0x250   :  { %1300 = vmatmul.mubr.bf16.vlgmr.msra.gmra.mrb[12].mxu1 %v1065_v10 }
 0x251   :  { %1575 = vmatpush3.bf16.msra.mxu1 %v1768_v12  ;;  %1590 = vmatprep.mubr.msk.bf16.mxu1 %vm1912_vm1, %v1911_v35 }
 0x252   :  { %1576 = vmatprep.subr.bf16.mxu1 %v1911_v35 }
 0x255   :  { %1577 = vmatpush3.bf16.msra.mxu1 %v1769_v59 }
 0x256   :  { %1578 = vmatprep.subr.bf16.mxu1 %v1911_v35 }
 0x259   :  { %1579 = vmatpush3.bf16.msra.mxu1 %v1770_v60 }
 0x25a   :  { %1580 = vmatprep.subr.bf16.mxu1 %v1911_v35 }
 0x25d   :  { %1581 = vmatpush3.bf16.msra.mxu1 %v1771_v62 }
 0x25e   :  { %1582 = vmatprep.subr.bf16.mxu1 %v1911_v35 }
 0x261   :  { %1583 = vmatpush3.bf16.msra.mxu1 %v1772_v13 }
 0x262   :  { %1584 = vmatprep.subr.bf16.mxu1 %v1911_v35 }
 0x265   :  { %1585 = vmatpush3.bf16.msra.mxu1 %v1773_v14 }
 0x266   :  { %1586 = vmatprep.subr.bf16.mxu1 %v1911_v35 }
 0x269   :  { %1587 = vmatpush3.bf16.msra.mxu1 %v1774_v15 }
 0x26a   :  { %1588 = vmatprep.subr.bf16.mxu1 %v1911_v35 }
 0x26d   :  { %1589 = vmatpush3.bf16.msra.mxu1 %v1775_v16 }
 0x270   :  { %1591 = vmatmul.mubr.bf16.vlgmr.msra.gmra.mrb[16].mxu1 %v1067_v56 }
 0x323   :  { %v1559_v17 = vpop.f32.mrb[12].mxu1 }
 0x324   :  { %v1560_v18 = vpop.f32.mrb[13].mxu1 }
 0x325   :  { %v1561_v19 = vadd.f32 %v1560_v18, %v1559_v17  ;;  %v1562_v20 = vpop.f32.mrb[14].mxu1 }
 0x326   :  { %v1563_v21 = vpop.f32.mrb[15].mxu1 }
 0x327   :  { %v1564_v22 = vadd.f32 %v1563_v21, %v1562_v20  ;;  %v1302_v24 = vadd.f32 %v1561_v19, %v1474_v23 }
 0x329   :  { %v1305_v28 = vadd.f32 %v1564_v22, %v1474_v23 }
 0x343   :  { %v1342_v25 = vpop.f32.mrb[16].mxu1 }
 0x344   :  { %v1343_v26 = vadd.f32 %v1342_v25, %v1302_v24  ;;  %v1592_v27 = vpop.f32.mrb[17].mxu1 }
 0x345   :  { %v1345_v29 = vpop.f32.mrb[18].mxu1 }
 0x346   :  { %1776 = vtanh.f32 %v1343_v26  ;;  %v1346_v30 = vadd.f32 %v1345_v29, %v1305_v28  ;;  %v1593_v31 = vpop.f32.mrb[19].mxu1 }
 0x348   :  { %1778 = vtanh.f32 %v1346_v30 }
 0x350   :  { %v1777_v32 = vpop.eup %1776 }
 0x351   :  { %1351 = vst [vmem:[#allocation10] sm:$0xff] %v1777_v32 }
 0x352   :  { %v1779_v33 = vpop.eup %1778 }
 0x353   :  { %1352 = vst [vmem:[#allocation10 + $0x8] sm:$0xff] %v1779_v33 }
 0x354   :  { %1357 = vsyncadd [#allocation4], 224  ;;  %s1913_s13 = smov [#allocation10]  }
 0x355   :  { %s1358_s14 = sshll.u32 %s1913_s13, 4  ;;  %s1359_s14 = int_to_ptr.vmem [resolvable:$true] %s1358_s14 }
 0x356   :  { %s1868_s15 = scalar_lea.vmem %s1359_s14, 32  ;;  %s1872_s6 = scalar_lea.vmem %s1359_s14, 256 }
 0x357   :  { %p1869_p4 = scmp.ne.s32.totalorder %s1359_s14, %s1868_s15  ;;  %p1873_p5 = scmp.lt.s32.totalorder %s1359_s14, %s1359_s14 }
 0x358   :  { %p1874_p6 = scmp.lt.s32.totalorder %s1872_s6, %s1868_s15 }
 0x35a   :  { %p1875_p7 = por %p1874_p6, %p1873_p5 }
 0x35c   :  { %p1876_p8 = pnand %p1875_p7, %p1869_p4 }
 0x35e   :  { %1879 = shalt.err (!%p1876_p8)
}
 0x35f   :  { %s1880_s17 = scalar_lea.hbm %s2067_s7, 32 }
 0x360   :  { %p1881_p9 = scmp.ne.s32.totalorder %s2067_s7, %s1880_s17  ;;  %p1884_p10 = scmp.lt.u32.totalorder %s1880_s17, %s2067_s7 }
 0x362   :  { %p1886_p11 = pnand %p1884_p10, %p1881_p9 }
 0x364   :  { %1889 = shalt.err (!%p1886_p11)
}
 0x365   :  { %1364 = dma.vmem_to_hbm [thread:$0]  %s1359_s14, 32, %s2067_s7, [#allocation4], %s1902_s25, %s1902_s25, %s1903_s26  }
 0x366   :  { %1896 = dma.done.wait [#allocation4], 256  }
 0x367   :  { %1897 = vsyncadd [#allocation4], 4294967040 }
 0x368   :  { %1368 = vsyncpa [#allocation3], 1 }
 0x369   :  { %1369 = vsyncpa [#allocation6], 1 }
 0x36a   :  { %1370 = vsyncpa [#allocation9], 1 }
 0x36b   :  { %1371 = vsyncpa [#allocation4], 1 }

</bundles_post_ra>
